<compile_context>
chip_gen: v6e
topology: v6e:2x2x1
jax: 0.10.0
libtpu: 0.0.40
codegen_flags: <defaults>
</compile_context>

<pallas_src>
import functools
import math

import jax
import jax.numpy as jnp
from jax.experimental import pallas as pl
from jax.experimental.pallas import tpu as pltpu


def _round_up(x, m):
    return ((x + m - 1) // m) * m


# ----------------------------- kernel ---------------------------------------

def mha_kernel(x_ref, wqkv_ref, bqkv_ref, w0_ref, b0_ref, o_ref, *,
               num_heads, attn_dim):
    """One grid step: multi-head self-attention for a (Bt, S, D) batch tile.

    x_ref    : (Bt, S, D)       activations
    wqkv_ref : (D, Npad)        fused Q|K|V weights, Q pre-scaled by 1/sqrt(A)
    bqkv_ref : (1, Npad)        fused Q|K|V bias (f32, Q part pre-scaled)
    w0_ref   : (H*A, D)         output projection
    b0_ref   : (1, D)           output bias (f32)
    o_ref    : (Bt, 1, S*D)     lane-dense output block
    """
    Bt, S, D = x_ref.shape
    H, A = num_heads, attn_dim
    HA = H * A
    cdtype = wqkv_ref.dtype                      # compute dtype (f32 or bf16)

    # ---- fused Q/K/V projection: one lane-dense matmul (N padded to 128k),
    #      f32 accumulation + f32 bias add.  No per-score scale: 1/sqrt(A) is
    #      already folded into the Q columns of wqkv. ----
    x2 = x_ref[...].reshape(Bt * S, D)
    qkv = jnp.dot(x2, wqkv_ref[...], preferred_element_type=jnp.float32)
    qkv = (qkv + bqkv_ref[...]).astype(cdtype)                 # (Bt*S, Npad)

    # ---- head-batched attention: fold heads into the leading batch axis ----
    def head_fold(seg):
        # (Bt*S, Npad) --per-head lane slice--> H x (Bt, S, A)
        #              --leading-axis concat--> (H*Bt, S, A)
        base = seg * HA
        return jnp.concatenate(
            [qkv[:, base + h * A: base + (h + 1) * A].reshape(Bt, S, A)
             for h in range(H)], axis=0)

    qb = head_fold(0)                                          # (H*Bt, S, A)
    kb = head_fold(1)
    vb = head_fold(2)

    # scores / softmax in f32; single batched einsum over all H*Bt problems
    s = jnp.einsum('nqa,nka->nqk', qb, kb,
                   preferred_element_type=jnp.float32)         # (H*Bt, S, S)
    s = s - jnp.max(s, axis=-1, keepdims=True)
    e = jnp.exp(s)
    # approx reciprocal lands on the EUP slot (nearly free); rows sum to 1
    # only to ~1e-3/1e-4 -- switch to approx=False if bit-exactness matters.
    p = e * pl.reciprocal(jnp.sum(e, axis=-1, keepdims=True), approx=True)

    ctx_b = jnp.einsum('nqk,nka->nqa', p.astype(cdtype), vb,
                       preferred_element_type=jnp.float32)     # (H*Bt, S, A)

    # un-fold heads back into lanes; matches torch.cat([head(x) ...], dim=-1)
    ctx = jnp.concatenate([ctx_b[h * Bt:(h + 1) * Bt] for h in range(H)],
                          axis=-1)                             # (Bt, S, HA)

    # ---- W0 projection: single (Bt*S, HA) @ (HA, D) matmul, f32 acc ----
    out = jnp.dot(ctx.reshape(Bt * S, HA).astype(cdtype), w0_ref[...],
                  preferred_element_type=jnp.float32) + b0_ref[...]
    out = out.reshape(Bt, S, D)

    # ---- lane-dense store: pack the S rows of each batch element into one
    #      S*D-wide (>=128-lane) row via static sublane slices + lane concat,
    #      then store the whole block unmasked. ----
    wide = jnp.concatenate([out[:, i:i + 1, :] for i in range(S)],
                           axis=-1)                            # (Bt, 1, S*D)
    o_ref[...] = wide.astype(o_ref.dtype)


# ------------------------ one-time weight fusion ------------------------------

def fuse_params(params, compute_dtype=jnp.float32):
    """Host-side, ONE-TIME weight fusion (hoisted out of the per-call path).

    Builds the fused (D, Npad) Q|K|V projection (Q pre-scaled by 1/sqrt(A),
    N zero-padded to a multiple of 128 lanes), the fused bias, and the
    flattened (H*A, D) W0.  Call once; reuse the result for every forward.
    On v5e prefer compute_dtype=jnp.float32 (no bf16 VPU/EUP there).
    """
    H, D, A = params["wq"].shape
    HA = H * A
    scale = 1.0 / math.sqrt(A)

    to2d = lambda w: w.transpose(1, 0, 2).reshape(D, HA)       # (H,D,A)->(D,HA)
    wqkv = jnp.concatenate(
        [to2d(params["wq"]) * scale, to2d(params["wk"]), to2d(params["wv"])],
        axis=1)                                                # (D, 3*HA)
    bqkv = jnp.concatenate(
        [params["bq"].reshape(HA) * scale, params["bk"].reshape(HA),
         params["bv"].reshape(HA)]).reshape(1, 3 * HA)

    n_pad = max(_round_up(3 * HA, 128), 128)
    if n_pad != 3 * HA:                                        # fill lane tile
        wqkv = jnp.pad(wqkv, ((0, 0), (0, n_pad - 3 * HA)))
        bqkv = jnp.pad(bqkv, ((0, 0), (0, n_pad - 3 * HA)))

    return {
        "wqkv": wqkv.astype(compute_dtype),
        "bqkv": bqkv.astype(jnp.float32),                      # bias added in f32
        "w0": params["w0"].reshape(HA, D).astype(compute_dtype),
        "b0": params["b0"].reshape(1, D).astype(jnp.float32),
        "num_heads": H,
        "attn_dim": A,
    }


# ----------------------------- wrapper ---------------------------------------

def _pick_batch_block(B, S):
    # Target ~512 rows of (rows, D) per grid step (mem-bound tiling sweet
    # spot), but keep >= 2 grid steps when possible so both v7x TensorCores
    # get work from the "parallel" batch axis.  On v7x (64 MiB VMEM) also
    # re-derive this against the smaller budget / set vmem_limit_bytes.
    bt = max(1, min(B, max(1, 512 // max(S, 1))))
    if B >= 2:
        bt = min(bt, B // 2)
    bt = max(bt, 1)
    while B % bt:
        bt -= 1
    return bt


def multi_head_attention(x, fused, *, batch_block=None, out_dtype=None):
    """x: (B, S, D).  fused: output of fuse_params()."""
    B, S, D = x.shape
    H, A = fused["num_heads"], fused["attn_dim"]
    HA = H * A
    compute_dtype = fused["wqkv"].dtype
    if out_dtype is None:
        # bf16 compute -> bf16 output halves writeback bytes on this
        # memory/overhead-bound kernel; f32 compute keeps an f32 output.
        out_dtype = compute_dtype

    Bt = batch_block if batch_block is not None else _pick_batch_block(B, S)
    assert B % Bt == 0, (B, Bt)
    n_pad = fused["wqkv"].shape[1]

    x_c = x.astype(compute_dtype)
    kernel = functools.partial(mha_kernel, num_heads=H, attn_dim=A)

    # Constant weight blocks (index map is always the same block).  On v7x,
    # pipeline_mode=pl.Buffered(1) here single-buffers them to free VMEM.
    const = lambda shape: pl.BlockSpec(shape, lambda b: (0,) * len(shape))

    out_wide = pl.pallas_call(
        kernel,
        # Lane-dense output presentation: (B, 1, S*D) with S*D >= 128 lanes;
        # reshaped back to (B, S, D) below (free XLA reshape).
        out_shape=jax.ShapeDtypeStruct((B, 1, S * D), out_dtype),
        grid=(B // Bt,),
        in_specs=[
            pl.BlockSpec((Bt, S, D), lambda b: (b, 0, 0)),     # x tile
            const((D, n_pad)),                                 # fused Wqkv
            const((1, n_pad)),                                 # fused bqkv
            const((HA, D)),                                    # W0
            const((1, D)),                                     # b0
        ],
        out_specs=pl.BlockSpec((Bt, 1, S * D), lambda b: (b, 0, 0)),
        compiler_params=pltpu.CompilerParams(
            dimension_semantics=("parallel",)),
    )(x_c, fused["wqkv"], fused["bqkv"], fused["w0"], fused["b0"])

    return out_wide.reshape(B, S, D)


def init_params(key, D, H, A):
    """Deterministic synthetic parameters (shapes mirror the PyTorch module)."""
    ks = jax.random.split(key, 8)
    s = 0.1
    return {
        # per-head Q/K/V projections: (H, D, A) weights, (H, A) biases
        "wq": s * jax.random.normal(ks[0], (H, D, A), jnp.float32),
        "bq": s * jax.random.normal(ks[1], (H, A), jnp.float32),
        "wk": s * jax.random.normal(ks[2], (H, D, A), jnp.float32),
        "bk": s * jax.random.normal(ks[3], (H, A), jnp.float32),
        "wv": s * jax.random.normal(ks[4], (H, D, A), jnp.float32),
        "bv": s * jax.random.normal(ks[5], (H, A), jnp.float32),
        # W0: Linear(H*A -> D), stored split per head as (H, A, D)
        "w0": s * jax.random.normal(ks[6], (H, A, D), jnp.float32),
        "b0": s * jax.random.normal(ks[7], (1, D), jnp.float32),
    }


# ------------------------ pure-JAX reference ---------------------------------

def mha_ref(x, p):
    H, _, A = p["wq"].shape
    outs = []
    for h in range(H):
        q = x @ p["wq"][h] + p["bq"][h]
        k = x @ p["wk"][h] + p["bk"][h]
        v = x @ p["wv"][h] + p["bv"][h]
        s = jnp.einsum("bqa,bka->bqk", q, k) / math.sqrt(A)
        w = jax.nn.softmax(s, -1)
        outs.append(jnp.einsum("bqk,bka->bqa", w, v))
    cat = jnp.concatenate(outs, -1)
    return cat @ p["w0"].reshape(H * A, -1) + p["b0"][0]


# ----------------------------- main ------------------------------------------

if __name__ == "__main__":
    B, S = 2, 8                 # batch, sequence length
    D = 32                      # input_size
    H = 2                       # num_heads
    A = 16                      # output_size (per-head attention dim)

    key = jax.random.PRNGKey(0)
    kx, kp = jax.random.split(key)
    x = jax.random.normal(kx, (B, S, D), jnp.float32)
    params = init_params(kp, D, H, A)

    ref = mha_ref(x, params)

    # ---- f32 compute path (default; also the right choice on v5e) ----
    fused_f32 = fuse_params(params, jnp.float32)        # fused ONCE, reused
    out = jax.block_until_ready(multi_head_attention(x, fused_f32))
    assert out.shape == (B, S, D)
    assert out.dtype == jnp.float32
    err = float(jnp.max(jnp.abs(out - ref)))
    assert jnp.allclose(out, ref, atol=2e-3, rtol=2e-3), err

    # ---- bf16 weights/activations, f32 accumulation, bf16 output ----
    fused_bf16 = fuse_params(params, jnp.bfloat16)      # fused ONCE, reused
    out_bf16 = jax.block_until_ready(multi_head_attention(x, fused_bf16))
    assert out_bf16.dtype == jnp.bfloat16
    err_bf16 = float(jnp.max(jnp.abs(out_bf16.astype(jnp.float32) - ref)))
    assert jnp.allclose(out_bf16.astype(jnp.float32), ref,
                        atol=5e-2, rtol=5e-2), err_bf16

    print("KERNEL_OK")
</pallas_src>

<mosaic_0001>
module attributes {stable_mosaic.version = 11 : i64} {
  func.func @mha_kernel(%arg0: i32, %arg1: memref<1x8x32xf32, #tpu.memory_space<vmem>>, %arg2: memref<32x128xf32, #tpu.memory_space<vmem>>, %arg3: memref<1x128xf32, #tpu.memory_space<vmem>>, %arg4: memref<32x32xf32, #tpu.memory_space<vmem>>, %arg5: memref<1x32xf32, #tpu.memory_space<vmem>>, %arg6: memref<1x1x256xf32, #tpu.memory_space<vmem>>) attributes {dimension_semantics = [#tpu.dimension_semantics<parallel>], iteration_bounds = array<i64: 2>, scalar_prefetch = 0 : i64, scratch_operands = 0 : i64, tpu.core_type = #tpu.core_type<tc>, window_params = [{transform_indices = @transform_0, window_bounds = array<i64: 1, 8, 32>}, {pipeline_mode = #tpu.pipeline_mode<synchronous>, transform_indices = @transform_1, window_bounds = array<i64: 32, 128>}, {pipeline_mode = #tpu.pipeline_mode<synchronous>, transform_indices = @transform_2, window_bounds = array<i64: 1, 128>}, {pipeline_mode = #tpu.pipeline_mode<synchronous>, transform_indices = @transform_3, window_bounds = array<i64: 32, 32>}, {pipeline_mode = #tpu.pipeline_mode<synchronous>, transform_indices = @transform_4, window_bounds = array<i64: 1, 32>}, {transform_indices = @transform_5, window_bounds = array<i64: 1, 1, 256>}]} {
    %c0 = arith.constant 0 : index
    %c0_0 = arith.constant 0 : index
    %c0_1 = arith.constant 0 : index
    %0 = vector.load %arg1[%c0, %c0_0, %c0_1] : memref<1x8x32xf32, #tpu.memory_space<vmem>>, vector<1x8x32xf32>
    %1 = vector.shape_cast %0 : vector<1x8x32xf32> to vector<8x32xf32>
    %c0_2 = arith.constant 0 : index
    %c0_3 = arith.constant 0 : index
    %2 = vector.load %arg2[%c0_2, %c0_3] : memref<32x128xf32, #tpu.memory_space<vmem>>, vector<32x128xf32>
    %cst = arith.constant dense<0.000000e+00> : vector<8x128xf32>
    %3 = tpu.matmul %1, %2, %cst {dimension_numbers = #tpu.dot_dimension_numbers<[1], [0], [0], [1], [0, 0, 1, 1], [], []>} : vector<8x32xf32>, vector<32x128xf32>, vector<8x128xf32> -> vector<8x128xf32>
    %c0_4 = arith.constant 0 : index
    %c0_5 = arith.constant 0 : index
    %4 = vector.load %arg3[%c0_4, %c0_5] : memref<1x128xf32, #tpu.memory_space<vmem>>, vector<1x128xf32>
    %5 = vector.broadcast %4 : vector<1x128xf32> to vector<8x128xf32>
    %6 = arith.addf %3, %5 : vector<8x128xf32>
    %7 = vector.extract_strided_slice %6 {offsets = [0, 0], sizes = [8, 16], strides = [1, 1]} : vector<8x128xf32> to vector<8x16xf32>
    %8 = vector.shape_cast %7 : vector<8x16xf32> to vector<1x8x16xf32>
    %9 = vector.extract_strided_slice %6 {offsets = [0, 16], sizes = [8, 16], strides = [1, 1]} : vector<8x128xf32> to vector<8x16xf32>
    %10 = vector.shape_cast %9 : vector<8x16xf32> to vector<1x8x16xf32>
    %11 = tpu.concatenate %8, %10 in 0 : vector<1x8x16xf32>, vector<1x8x16xf32> -> vector<2x8x16xf32>
    %12 = vector.extract_strided_slice %6 {offsets = [0, 32], sizes = [8, 16], strides = [1, 1]} : vector<8x128xf32> to vector<8x16xf32>
    %13 = vector.shape_cast %12 : vector<8x16xf32> to vector<1x8x16xf32>
    %14 = vector.extract_strided_slice %6 {offsets = [0, 48], sizes = [8, 16], strides = [1, 1]} : vector<8x128xf32> to vector<8x16xf32>
    %15 = vector.shape_cast %14 : vector<8x16xf32> to vector<1x8x16xf32>
    %16 = tpu.concatenate %13, %15 in 0 : vector<1x8x16xf32>, vector<1x8x16xf32> -> vector<2x8x16xf32>
    %17 = vector.extract_strided_slice %6 {offsets = [0, 64], sizes = [8, 16], strides = [1, 1]} : vector<8x128xf32> to vector<8x16xf32>
    %18 = vector.shape_cast %17 : vector<8x16xf32> to vector<1x8x16xf32>
    %19 = vector.extract_strided_slice %6 {offsets = [0, 80], sizes = [8, 16], strides = [1, 1]} : vector<8x128xf32> to vector<8x16xf32>
    %20 = vector.shape_cast %19 : vector<8x16xf32> to vector<1x8x16xf32>
    %21 = tpu.concatenate %18, %20 in 0 : vector<1x8x16xf32>, vector<1x8x16xf32> -> vector<2x8x16xf32>
    "tpu.trace_start"() <{level = 10 : i32, message = "nqa,nka->nqk"}> : () -> ()
    %cst_6 = arith.constant dense<0.000000e+00> : vector<2x8x8xf32>
    %22 = tpu.matmul %11, %16, %cst_6 {dimension_numbers = #tpu.dot_dimension_numbers<[2], [2], [1], [1], [0, 0, 0, 1, 1, 1], [0], [0]>} : vector<2x8x16xf32>, vector<2x8x16xf32>, vector<2x8x8xf32> -> vector<2x8x8xf32>
    "tpu.trace_stop"() : () -> ()
    %cst_7 = arith.constant dense<0xFF800000> : vector<2x8xf32>
    %23 = vector.multi_reduction <maximumf>, %22, %cst_7 [2] : vector<2x8x8xf32> to vector<2x8xf32>
    %24 = vector.shape_cast %23 : vector<2x8xf32> to vector<2x8x1xf32>
    %25 = vector.broadcast %24 : vector<2x8x1xf32> to vector<2x8x8xf32>
    %26 = arith.subf %22, %25 : vector<2x8x8xf32>
    %27 = math.exp %26 : vector<2x8x8xf32>
    %cst_8 = arith.constant dense<0.000000e+00> : vector<2x8xf32>
    %28 = vector.multi_reduction <add>, %27, %cst_8 [2] : vector<2x8x8xf32> to vector<2x8xf32>
    %29 = vector.shape_cast %28 : vector<2x8xf32> to vector<2x8x1xf32>
    %30 = tpu.reciprocal %29 {approx = true} : vector<2x8x1xf32> -> vector<2x8x1xf32>
    %31 = vector.broadcast %30 : vector<2x8x1xf32> to vector<2x8x8xf32>
    %32 = arith.mulf %27, %31 : vector<2x8x8xf32>
    "tpu.trace_start"() <{level = 10 : i32, message = "nqk,nka->nqa"}> : () -> ()
    %cst_9 = arith.constant dense<0.000000e+00> : vector<2x8x16xf32>
    %33 = tpu.matmul %32, %21, %cst_9 {dimension_numbers = #tpu.dot_dimension_numbers<[2], [1], [1], [2], [0, 0, 0, 1, 1, 2], [0], [0]>} : vector<2x8x8xf32>, vector<2x8x16xf32>, vector<2x8x16xf32> -> vector<2x8x16xf32>
    "tpu.trace_stop"() : () -> ()
    %34 = vector.extract_strided_slice %33 {offsets = [0, 0, 0], sizes = [1, 8, 16], strides = [1, 1, 1]} : vector<2x8x16xf32> to vector<1x8x16xf32>
    %35 = vector.extract_strided_slice %33 {offsets = [1, 0, 0], sizes = [1, 8, 16], strides = [1, 1, 1]} : vector<2x8x16xf32> to vector<1x8x16xf32>
    %36 = tpu.concatenate %34, %35 in 2 : vector<1x8x16xf32>, vector<1x8x16xf32> -> vector<1x8x32xf32>
    %37 = vector.shape_cast %36 : vector<1x8x32xf32> to vector<8x32xf32>
    %c0_10 = arith.constant 0 : index
    %c0_11 = arith.constant 0 : index
    %38 = vector.load %arg4[%c0_10, %c0_11] : memref<32x32xf32, #tpu.memory_space<vmem>>, vector<32x32xf32>
    %cst_12 = arith.constant dense<0.000000e+00> : vector<8x32xf32>
    %39 = tpu.matmul %37, %38, %cst_12 {dimension_numbers = #tpu.dot_dimension_numbers<[1], [0], [0], [1], [0, 0, 1, 1], [], []>} : vector<8x32xf32>, vector<32x32xf32>, vector<8x32xf32> -> vector<8x32xf32>
    %c0_13 = arith.constant 0 : index
    %c0_14 = arith.constant 0 : index
    %40 = vector.load %arg5[%c0_13, %c0_14] : memref<1x32xf32, #tpu.memory_space<vmem>>, vector<1x32xf32>
    %41 = vector.broadcast %40 : vector<1x32xf32> to vector<8x32xf32>
    %42 = arith.addf %39, %41 : vector<8x32xf32>
    %43 = vector.shape_cast %42 : vector<8x32xf32> to vector<1x8x32xf32>
    %44 = vector.extract_strided_slice %43 {offsets = [0, 0, 0], sizes = [1, 1, 32], strides = [1, 1, 1]} : vector<1x8x32xf32> to vector<1x1x32xf32>
    %45 = vector.extract_strided_slice %43 {offsets = [0, 1, 0], sizes = [1, 1, 32], strides = [1, 1, 1]} : vector<1x8x32xf32> to vector<1x1x32xf32>
    %46 = vector.extract_strided_slice %43 {offsets = [0, 2, 0], sizes = [1, 1, 32], strides = [1, 1, 1]} : vector<1x8x32xf32> to vector<1x1x32xf32>
    %47 = vector.extract_strided_slice %43 {offsets = [0, 3, 0], sizes = [1, 1, 32], strides = [1, 1, 1]} : vector<1x8x32xf32> to vector<1x1x32xf32>
    %48 = vector.extract_strided_slice %43 {offsets = [0, 4, 0], sizes = [1, 1, 32], strides = [1, 1, 1]} : vector<1x8x32xf32> to vector<1x1x32xf32>
    %49 = vector.extract_strided_slice %43 {offsets = [0, 5, 0], sizes = [1, 1, 32], strides = [1, 1, 1]} : vector<1x8x32xf32> to vector<1x1x32xf32>
    %50 = vector.extract_strided_slice %43 {offsets = [0, 6, 0], sizes = [1, 1, 32], strides = [1, 1, 1]} : vector<1x8x32xf32> to vector<1x1x32xf32>
    %51 = vector.extract_strided_slice %43 {offsets = [0, 7, 0], sizes = [1, 1, 32], strides = [1, 1, 1]} : vector<1x8x32xf32> to vector<1x1x32xf32>
    %52 = tpu.concatenate %44, %45, %46, %47, %48, %49, %50, %51 in 2 : vector<1x1x32xf32>, vector<1x1x32xf32>, vector<1x1x32xf32>, vector<1x1x32xf32>, vector<1x1x32xf32>, vector<1x1x32xf32>, vector<1x1x32xf32>, vector<1x1x32xf32> -> vector<1x1x256xf32>
    %c0_15 = arith.constant 0 : index
    %c0_16 = arith.constant 0 : index
    %c0_17 = arith.constant 0 : index
    %53 = vector.load %arg6[%c0_15, %c0_16, %c0_17] : memref<1x1x256xf32, #tpu.memory_space<vmem>>, vector<1x1x256xf32>
    tpu.vector_store %arg6[%c0_15, %c0_16, %c0_17], %52 {strides = array<i32>} : memref<1x1x256xf32, #tpu.memory_space<vmem>>, vector<1x1x256xf32>,
    return
  }
  func.func @transform_0(%arg0: i32) -> (i32, i32, i32) {
    %c0_i32 = arith.constant 0 : i32
    %c0_i32_0 = arith.constant 0 : i32
    %c0_i32_1 = arith.constant 0 : i32
    return %arg0, %c0_i32, %c0_i32_0 : i32, i32, i32
  }
  func.func @transform_1(%arg0: i32) -> (i32, i32) {
    %c0_i32 = arith.constant 0 : i32
    %c0_i32_0 = arith.constant 0 : i32
    %c0_i32_1 = arith.constant 0 : i32
    return %c0_i32, %c0_i32_0 : i32, i32
  }
  func.func @transform_2(%arg0: i32) -> (i32, i32) {
    %c0_i32 = arith.constant 0 : i32
    %c0_i32_0 = arith.constant 0 : i32
    %c0_i32_1 = arith.constant 0 : i32
    return %c0_i32, %c0_i32_0 : i32, i32
  }
  func.func @transform_3(%arg0: i32) -> (i32, i32) {
    %c0_i32 = arith.constant 0 : i32
    %c0_i32_0 = arith.constant 0 : i32
    %c0_i32_1 = arith.constant 0 : i32
    return %c0_i32, %c0_i32_0 : i32, i32
  }
  func.func @transform_4(%arg0: i32) -> (i32, i32) {
    %c0_i32 = arith.constant 0 : i32
    %c0_i32_0 = arith.constant 0 : i32
    %c0_i32_1 = arith.constant 0 : i32
    return %c0_i32, %c0_i32_0 : i32, i32
  }
  func.func @transform_5(%arg0: i32) -> (i32, i32, i32) {
    %c0_i32 = arith.constant 0 : i32
    %c0_i32_0 = arith.constant 0 : i32
    %c0_i32_1 = arith.constant 0 : i32
    return %arg0, %c0_i32, %c0_i32_0 : i32, i32, i32
  }
}

</mosaic_0001>

<bundles_post_ra>
// kernel: tpu_custom_call.1
= control target key start
LH: loop header
LB: loop body
LE: loop exit
PB: predicated region body
PF: predicated region fallthrough
CT: control target
= control target key end

     0   :  { %10 = vsyncpa [#allocation3], 0  ;;  %s1523_s0 = inlined_call_operand.hbm [shape: f32[2,8,32], index: 0, kind: input, shape index: {}]   ;;  %s1524_s1 = inlined_call_operand.hbm [shape: f32[32,128], index: 1, kind: input, shape index: {}]   ;;  %s1525_s2 = inlined_call_operand.vmem [shape: f32[1,128], index: 2, kind: input, shape index: {}]   ;;  %s1526_s3 = inlined_call_operand.hbm [shape: f32[32,32], index: 3, kind: input, shape index: {}]   ;;  %s1527_s4 = inlined_call_operand.vmem [shape: f32[1,32], index: 4, kind: input, shape index: {}]   ;;  %s1528_s5 = inlined_call_operand.hbm [shape: f32[2,1,256], index: 5, kind: output, shape index: {}]  }
   0x1   :  { %12 = vsyncpa [#allocation3 + $0x1], 0 }
   0x2   :  { %13 = vsyncpa [#allocation6], 0 }
   0x3   :  { %14 = vsyncpa [#allocation4], 0 }
   0x4   :  { %16 = vsyncpa [#allocation4 + $0x1], 0  ;;  %s1304_s18 = smov 0   ;;  %s1306_s19 = smov 0  }
   0x5   :  { %s1308_s20 = smov 0   ;;  %s1310_s21 = smov 0  }
   0x6 LB: > { %s1325_s22 = sadd.s32 4294967295, %s1258_s21   ;;  %s937_s23 = sadd.s32 4294967294, %s1258_s21   ;;  %s1258_s21 = sphi %s1310_s21, %s1550_s21   ;;  %s1254_s20 = sphi %s1308_s20, %s1549_s20   ;;  %s1250_s19 = sphi %s1306_s19, %s1548_s19   ;;  %s1246_s18 = sphi %s1304_s18, %s1547_s18  }
   0x7   : > { %p42_p0 = scmp.ne.s32.totalorder %s1250_s19, %s1246_s18  ;;  %p1529_p1 = scmp.eq.s32.totalorder %s1325_s22, 0 }
   0x8   : > { %p156_p3 = scmp.eq.s32.totalorder %s937_s23, 1  ;;  %p938_p5 = scmp.ge.s32.totalorder %s1258_s21, 1 }
   0x9   : > { %p1334_p4 = por %p1529_p1, %p42_p0  ;;  %p163_p7 = scmp.lt.s32.totalorder %s1258_s21, 3 }
   0xa   : > { %p1339_p6 = por %p156_p3, %p42_p0  ;;  %s1260_s27 = smov [#allocation5]  }
   0xb   : > { %s1533_s24 = scalar_select %p1334_p4, 1, 0 }
   0xc   : > { %s1534_s25 = scalar_select %p1339_p6, 1, 0 }
   0xd   : > { %p1344_p8 = pnand %p938_p5, %p163_p7  ;;  %s175_s28 = sshll.u32 %s1260_s27, 4  ;;  %s176_s28 = int_to_ptr.vmem [resolvable:$true] %s175_s28 }
   0xe   : > { %s1261_s30 = smov [#allocation7]   ;;  %s1121_s7 = scalar_lea.vmem %s176_s28, 512 }
   0xf   : > { %s1535_s26 = scalar_select %p1344_p8, 1, 0 }
  0x10   : > { %p1037_p9 = pneg %p1344_p8  ;;  %s191_s6 = sshll.u32 %s1261_s30, 4  ;;  %s192_s6 = int_to_ptr.vmem [resolvable:$true] %s191_s6 }
  0x11   : > { %p1122_p13 = scmp.ne.s32.totalorder %s176_s28, %s1121_s7  ;;  %p1129_p5 = scmp.lt.s32.totalorder %s176_s28, %s176_s28 }
  0x12   : > { %p1353_p11 = pnand %p1037_p9, %p1529_p1  ;;  %p1130_p7 = scmp.lt.s32.totalorder %s1121_s7, %s1121_s7 }
  0x14   : > { %p1112_p12 = pneg %p1353_p11  ;;  %p1131_p10 = por %p1130_p7, %p1129_p5 }
  0x16   : > { %p1124_p0 = pnand %p1122_p13, %p1112_p12 }
  0x18   : > { %p1125_p3 = pneg %p1124_p0 }
  0x1a   : > { %p1132_p9 = pnand %p1131_p10, %p1125_p3 }
  0x1c   : > { %1135 = shalt.err (!%p1132_p9)
}
  0x1d   : > { %s1262_s8 = smov 128   ;;  %s1263_s9 = smov 8  }
  0x1e   : > { %1040 = dma.hbm_to_vmem [thread:$0]  (!%p1353_p11), %s1524_s1, 512, %s176_s28, [#allocation6], %s1262_s8, %s1262_s8, %s1263_s9  }
  0x1f   : > { %s1147_s12 = scalar_lea.vmem %s192_s6, 512  ;;  %p1155_p2 = scmp.lt.s32.totalorder %s192_s6, %s192_s6 }
  0x20   : > { %p1148_p1 = scmp.ne.s32.totalorder %s192_s6, %s1147_s12  ;;  %p1156_p6 = scmp.lt.s32.totalorder %s1147_s12, %s1147_s12 }
  0x22   : > { %p1150_p13 = pnand %p1148_p1, %p1112_p12  ;;  %p1157_p5 = por %p1156_p6, %p1155_p2 }
  0x24   : > { %p1151_p0 = pneg %p1150_p13 }
  0x26   : > { %p1158_p10 = pnand %p1157_p5, %p1151_p0 }
  0x28   : > { %1161 = shalt.err (!%p1158_p10)
}
  0x29   : > { %1043 = dma.hbm_to_vmem [thread:$0]  (!%p1353_p11), %s1526_s3, 512, %s192_s6, [#allocation6], %s1262_s8, %s1262_s8, %s1263_s9  }
  0x2a   : > { %s1376_s15 = sadd.s32 1, %s1258_s21   ;;  %s29_s16 = sadd.s32 1, %s1254_s20 }
  0x2b   : > { %s26_s17 = ssub.s32 %s1258_s21, %s1376_s15  ;;  %p36_p1 = scmp.ne.s32.totalorder %s1254_s20, %s1250_s19 }
  0x2c   : > { %p27_p2 = scmp.eq.s32.totalorder %s26_s17, 0  ;;  %p37_p6 = scmp.eq.s32.totalorder %s1258_s21, 0 }
  0x2d   : > { %p1537_p12 = scmp.eq.s32.totalorder %s1325_s22, 1  ;;  %p1054_p7 = scmp.lt.s32.totalorder %s1258_s21, 2 }
  0x2e   : > { %s1392_s27 = scalar_select %p27_p2, %s1254_s20, %s29_s16  }
  0x2f   : > { %p1386_p3 = por %p1537_p12, %p36_p1  ;;  %p38_p9 = por %p37_p6, %p36_p1 }
  0x30   : > { %s208_s28 = sand.u32 1, %s1254_s20   ;;  %s943_s30 = sshll.u32 %s1258_s21, 7 }
  0x31   : > { %s1538_s23 = scalar_select %p1386_p3, 1, 0 }
  0x32   : > { %s942_s29 = sshll.u32 %s208_s28, 3  ;;  %s1399_s8 = scalar_lea.hbm %s1523_s0, %s943_s30 }
  0x33   : > { %s212_s9 = scalar_lea.vmem [#allocation2], %s942_s29  ;;  %p1401_p11 = pnand %p1054_p7, %p38_p9 }
  0x34   : > { %s219_s10 = sshll.u32 %s212_s9, 4  ;;  %s209_s12 = scalar_lea.sflag [#allocation3], %s208_s28  ;;  %s220_s10 = int_to_ptr.vmem [resolvable:$true] %s219_s10 }
  0x35   : > { %s1162_s13 = scalar_lea.hbm %s1399_s8, 128  ;;  %p1164_p0 = pneg %p1401_p11 }
  0x36   : > { %p1163_p13 = scmp.ne.s32.totalorder %s1399_s8, %s1162_s13  ;;  %s1167_s17 = scalar_lea.hbm %s1523_s0, 256 }
  0x37   : > { %p1168_p1 = scmp.lt.s32.totalorder %s1399_s8, %s1523_s0  ;;  %p1169_p2 = scmp.lt.s32.totalorder %s1167_s17, %s1162_s13 }
  0x38   : > { %p1165_p5 = pnand %p1164_p0, %p1163_p13 }
  0x39   : > { %p1170_p6 = por %p1169_p2, %p1168_p1 }
  0x3a   : > { %p1166_p10 = pneg %p1165_p5 }
  0x3c   : > { %p1171_p12 = pnand %p1170_p6, %p1166_p10 }
  0x3e   : > { %1174 = shalt.err (!%p1171_p12)
}
  0x3f   : > { %s1175_s6 = scalar_lea.vmem %s220_s10, 128  ;;  %s1264_s28 = smov [#allocation2]  }
  0x40   : > { %p1176_p7 = scmp.ne.s32.totalorder %s220_s10, %s1175_s6  ;;  %s1180_s7 = sshll.u32 %s1264_s28, 4  ;;  %s1181_s7 = int_to_ptr.vmem [resolvable:$false] %s1180_s7 }
  0x41   : > { %s1182_s9 = scalar_lea.vmem %s1181_s7, 256  ;;  %p1183_p13 = scmp.lt.s32.totalorder %s220_s10, %s1181_s7 }
  0x42   : > { %p1178_p9 = pnand %p1176_p7, %p1164_p0  ;;  %p1184_p5 = scmp.lt.s32.totalorder %s1182_s9, %s1175_s6 }
  0x44   : > { %p1179_p3 = pneg %p1178_p9  ;;  %p1185_p4 = por %p1184_p5, %p1183_p13 }
  0x46   : > { %p1186_p8 = pnand %p1185_p4, %p1179_p3 }
  0x48   : > { %1189 = shalt.err (!%p1186_p8)
}
  0x49   : > { %1047 = dma.hbm_to_vmem [thread:$0]  (!%p1401_p11), %s1399_s8, 128, %s220_s10, %s209_s12  }
  0x4a   : > { %p1540_p10 = scmp.ne.s32.totalorder %s1535_s26, 0 }
  0x4b   : > { %s1422_s13 = sand.u32 (!%p1540_p10), 1, %s1250_s19   ;;  %p1541_p0 = scmp.ne.s32.totalorder (!%p1540_p10), %s1533_s24, 0 }
  0x4c   : > { %228 = sbr.rel (%p1540_p10) target bundleno = 1677 (0x68d), region = 40  ;;  %s945_s14 = sshll.u32 (!%p1540_p10), %s1422_s13, 3 }
  0x4d   : > { %s231_s16 = scalar_lea.sflag (!%p1540_p10), [#allocation3], %s1422_s13  ;;  %s234_s17 = scalar_lea.vmem (!%p1540_p10), [#allocation2], %s945_s14 }
  0x51   : > { %1233 = dma.done.wait (%p1541_p0), %s231_s16, 128  }
  0x52   : > { %1235 = vsyncadd (%p1541_p0), %s231_s16, 4294967168  ;;  %p1542_p4 = scmp.eq.s32.totalorder %s1325_s22, 0 }
  0x54   : > { %1237 = dma.done.wait (%p1542_p4), [#allocation6], 1024   ;;  %p1543_p8 = pmov %p1542_p4 }
  0x55   : > { %v1265_v0 = vmov 0.0   ;;  %vm1266_vm0 = vmmov 0   ;;  %v273_v1 = vld [vmem:[#allocation5 + $0x18] sm:$0xff]  ;;  %v272_v2 = vld [vmem:[#allocation5 + $0x10] sm:$0xff]  ;;  %v271_v3 = vld [vmem:[#allocation5 + $0x8] sm:$0xff]  ;;  %vm281_vm1 = vcmask 261120   ;;  %v816_v61 = vlaneseq }
  0x56   : > { %1239 = vsyncadd (%p1543_p8), [#allocation6], 4294966272  ;;  %983 = vmatprep.subr.mxu0 %v1265_v0  ;;  %991 = vmatprep.mubr.msk.f32.mxu0 %vm1266_vm0, %v1265_v0  ;;  %v270_v4 = vld [vmem:[#allocation5] sm:$0xff]  ;;  %v269_v5 = vld [vmem:[%s234_s17] sm:$0xff]  ;;  %s1267_s8 = smov 112   ;;  %s1268_s10 = smov 96  }
  0x57   : > { %994 = vmatprep.subr.mxu1 %v1265_v0  ;;  %996 = vmatprep.mubr.msk.f32.mxu1 %vm1266_vm0, %v1265_v0  ;;  %v949_v6 = vld [vmem:[%s1525_s2] ss:$0 sm:$0xff]  ;;  %vm360_vm2 = vcmask 130048   ;;  %vm511_vm3 = vcmask 64512   ;;  %s1269_s11 = smov 64   ;;  %v694_v37 = vld [vmem:[#allocation7 + $0x18] sm:$0xff] }
  0x58   : > { %984 = vmatpush3.msra.mxu0 %v273_v1  ;;  %v693_v38 = vld [vmem:[#allocation7 + $0x10] sm:$0xff]  ;;  %v692_v39 = vld [vmem:[#allocation7 + $0x8] sm:$0xff]  ;;  %v691_v42 = vld [vmem:[#allocation7] sm:$0xff]  ;;  %s1270_s12 = smov 16   ;;  %s1271_s6 = smov 32   ;;  %v817_v1 = vshrl.u32 %v816_v61, 7 }
  0x59   : > { %985 = vmatprep.subr.mxu0 %v1265_v0  ;;  %v957_v47 = vld [vmem:[%s1527_s4] ss:$0 sm:$0xff]  ;;  %v1272_v59 = vmov 1966171168   ;;  %vm803_vm4 = vcmask 523264   ;;  %s948_s28 = sshll.u32 %s1422_s13, 1 }
  0x5a   : > { %986 = vmatpush3.msra.mxu0 %v272_v2  ;;  %v814_v60 = vunpack.c.l.s4 %v1272_v59  ;;  %vm805_vm5 = vcmask 785408   ;;  %s964_s7 = sshll.u32 %s1325_s22, 5  ;;  %s268_s9 = scalar_lea.vmem [#allocation8], %s948_s28  ;;  %vm830_vm6 = vcmp.lt.s32.totalorder %v816_v61, 256 }
  0x5b   : > { %987 = vmatprep.subr.mxu0 %v1265_v0  ;;  %s848_s14 = sshll.u32 %s268_s9, 4  ;;  %s846_s24 = scalar_lea.hbm %s1528_s5, %s964_s7  ;;  %s849_s14 = int_to_ptr.vmem [resolvable:$true] %s848_s14 }
  0x5c   : > { %988 = vmatpush3.msra.mxu0 %v271_v3  ;;  %s834_s26 = scalar_lea.sflag [#allocation4], %s1422_s13  ;;  %p1544_p11 = scmp.ne.s32.totalorder %s1538_s23, 0 }
  0x5d   : > { %989 = vmatprep.subr.mxu0 %v1265_v0 }
  0x5e   : > { %990 = vmatpush3.msra.mxu0 %v270_v4 }
  0x5f   : > { %992 = vmatmul.mubr.msk.f32.vlgmr.msra.gmra.mxu0 %vm281_vm1, %v269_v5  ;;  %1014 = vmatprep.subr.mxu0 %v1265_v0 }
  0x60   : > { %1022 = vmatprep.mubr.msk.f32.mxu0 %vm1266_vm0, %v1265_v0  ;;  %1015 = vmatpush3.msra.mxu0 %v694_v37 }
  0x61   : > { %1016 = vmatprep.subr.mxu0 %v1265_v0 }
  0x62   : > { %1017 = vmatpush3.msra.mxu0 %v693_v38 }
  0x63   : > { %1018 = vmatprep.subr.mxu0 %v1265_v0 }
  0x64   : > { %1019 = vmatpush3.msra.mxu0 %v692_v39 }
  0x65   : > { %1020 = vmatprep.subr.mxu0 %v1265_v0 }
  0x66   : > { %1021 = vmatpush3.msra.mxu0 %v691_v42 }
 0x11f   : > { %v351_v7 = vpop.f32.mrf.mxu0 }
 0x120   : > { %v352_v8 = vadd.f32 %v949_v6, %v351_v7 }
 0x121   : > { %v993_v9 = vpop.f32.mrf.mxu0 }
 0x122   : > { %356 = vrot.lane.b32.xlu0 %v352_v8, %s1267_s8  ;;  %s1190_s8 = scalar_lea.vmem %s849_s14, 32 }
 0x123   : > { %p1191_p3 = scmp.ne.s32.totalorder %s849_s14, %s1190_s8 }
 0x125   : > { %p1192_p1 = pnand %p1191_p3, %p1544_p11 }
 0x126   : > { %358 = vrot.lane.b32.xlu0 %v352_v8, %s1268_s10 }
 0x127   : > { %p1193_p2 = pneg %p1192_p1 }
 0x194   : > { %v357_v10 = vpop.permute.xlu0 %356 }
 0x195   : > { %435 = vrot.lane.b32.xlu1 %v357_v10, %s1268_s10 }
 0x198   : > { %v359_v11 = vpop.permute.xlu0 %358 }
 0x199   : > { %995 = vmatpush3.xpose.msk.msra.mxu1 %vm360_vm2, %v359_v11 }
 0x19a   : > { %999 = vmatprep.subr.mxu1 %v1265_v0 }
 0x19c   : > { %997 = vmatmul.mubr.msk.f32.vlgmr.msra.gmra.mxu1 %vm360_vm2, %v352_v8 }
 0x19d   : > { %1001 = vmatprep.mubr.msk.f32.mxu1 %vm1266_vm0, %v1265_v0 }
 0x207   : > { %v436_v12 = vpop.permute.xlu1 %435 }
 0x208   : > { %1000 = vmatpush3.xpose.msk.msra.mxu1 %vm360_vm2, %v436_v12 }
 0x209   : > { %1004 = vmatprep.subr.mxu1 %v1265_v0 }
 0x20b   : > { %1002 = vmatmul.mubr.msk.f32.vlgmr.msra.gmra.mxu1 %vm360_vm2, %v357_v10 }
 0x20c   : > { %1006 = vmatprep.mubr.msk.f32.mxu1 %vm1266_vm0, %v1265_v0 }
 0x25c   : > { %v431_v13 = vpop.f32.mrf.mxu1 }
 0x25d   : > { %v512_v14 = vsel %vm511_vm3, %v431_v13, -inf }
 0x25e   : > { %513 = vmax.xlane.f32.xlu1 %v512_v14  ;;  %v998_v15 = vpop.f32.mrf.mxu1 }
 0x2cb   : > { %v507_v16 = vpop.f32.mrf.mxu1 }
 0x2cc   : > { %v515_v17 = vsel %vm511_vm3, %v507_v16, -inf }
 0x2cd   : > { %516 = vmax.xlane.f32.xlu0 %v515_v17  ;;  %v1003_v18 = vpop.f32.mrf.mxu1 }
 0x2e7   : > { %v514_v19 = vpop.xlane.xlu1 %513 }
 0x2e8   : > { %v518_v20 = vsub.f32 %v431_v13, %v514_v19 }
 0x2ea   : > { %v520_v21 = vmul.f32 1.442695, %v518_v20 }
 0x2ec   : > { %1102 = vpow2.f32 %v520_v21 }
 0x2f9   : > { %v1103_v22 = vpop.eup %1102 }
 0x2fa   : > { %v524_v23 = vsel %vm511_vm3, %v1103_v22, 0.0 }
 0x2fb   : > { %525 = vadd.xlane.f32.xlu0 %v524_v23 }
 0x311   : > { %534 = vrot.lane.b32.xlu0 %v352_v8, %s1269_s11 }
 0x356   : > { %v517_v24 = vpop.xlane.xlu0 %516 }
 0x357   : > { %v519_v25 = vsub.f32 %v507_v16, %v517_v24 }
 0x359   : > { %v522_v26 = vmul.f32 1.442695, %v519_v25 }
 0x35b   : > { %1104 = vpow2.f32 %v522_v26 }
 0x368   : > { %v1105_v27 = vpop.eup %1104 }
 0x369   : > { %v527_v28 = vsel %vm511_vm3, %v1105_v27, 0.0 }
 0x36a   : > { %528 = vadd.xlane.f32.xlu1 %v527_v28 }
 0x37b   : > { %610 = vrot.lane.b32.xlu1 %v357_v10, %s1269_s11 }
 0x384   : > { %v526_v29 = vpop.xlane.xlu0 %525 }
 0x385   : > { %1106 = vrcp.f32 %v526_v29 }
 0x388   : > { %v535_v30 = vpop.permute.xlu0 %534 }
 0x389   : > { %1005 = vmatpush3.msra.mxu1 %v535_v30 }
 0x38a   : > { %1009 = vmatprep.subr.mxu1 %v1265_v0 }
 0x392   : > { %v1107_v31 = vpop.eup %1106 }
 0x393   : > { %v532_v32 = vmul.f32 %v1107_v31, %v1103_v22 }
 0x395   : > { %1007 = vmatmul.mubr.msk.f32.vlgmr.msra.gmra.mxu1 %vm511_vm3, %v532_v32 }
 0x396   : > { %1011 = vmatprep.mubr.msk.f32.mxu1 %vm1266_vm0, %v1265_v0  ;;  %v815_v0 = vunpack.c.0.s8 %v814_v60 }
 0x398   : > { %v818_v8 = vsub.s32 %v815_v0, %v817_v1 }
 0x3f3   : > { %v529_v33 = vpop.xlane.xlu1 %528 }
 0x3f4   : > { %1108 = vrcp.f32 %v529_v33 }
 0x3f7   : > { %v611_v34 = vpop.permute.xlu1 %610 }
 0x3f8   : > { %1010 = vmatpush3.msra.mxu1 %v611_v34 }
 0x401   : > { %v1109_v35 = vpop.eup %1108 }
 0x402   : > { %v533_v36 = vmul.f32 %v1109_v35, %v1105_v27 }
 0x404   : > { %1012 = vmatmul.mubr.msk.f32.vlgmr.msra.gmra.mxu1 %vm511_vm3, %v533_v36 }
 0x455   : > { %v606_v40 = vpop.f32.mrf.mxu1 }
 0x457   : > { %v1008_v41 = vpop.f32.mrf.mxu1 }
 0x4c4   : > { %v682_v43 = vpop.f32.mrf.mxu1 }
 0x4c5   : > { %687 = vrot.lane.b32.xlu1 %v682_v43, %s1270_s12 }
 0x4c6   : > { %v1013_v44 = vpop.f32.mrf.mxu1 }
 0x537   : > { %v688_v45 = vpop.permute.xlu1 %687 }
 0x538   : > { %v690_v46 = vsel %vm360_vm2, %v606_v40, %v688_v45 }
 0x539   : > { %1023 = vmatmul.mubr.msk.f32.vlgmr.msra.gmra.mxu0 %vm281_vm1, %v690_v46 }
 0x5f9   : > { %v771_v48 = vpop.f32.mrf.mxu0 }
 0x5fa   : > { %v772_v49 = vadd.f32 %v957_v47, %v771_v48 }
 0x5fb   : > { %v1024_v50 = vpop.f32.mrf.mxu0 }
 0x5fc   : > { %v790_v51 = vrot.slane %v772_v49, 5  ;;  %v776_v52 = vrot.slane %v772_v49, 1  ;;  %v794_v53 = vrot.slane %v772_v49, 6  ;;  %v780_v54 = vrot.slane %v772_v49, 2 }
 0x5fd   : > { %v798_v55 = vrot.slane %v772_v49, 7  ;;  %v784_v56 = vrot.slane %v772_v49, 3  ;;  %v788_v2 = vrot.slane %v772_v49, 4 }
 0x5fe   : > { %791 = vrot.lane.b32.xlu1 %v790_v51, %s1271_s6  ;;  %777 = vrot.lane.b32.xlu0 %v776_v52, %s1271_s6 }
 0x602   : > { %795 = vrot.lane.b32.xlu1 %v794_v53, %s1269_s11  ;;  %781 = vrot.lane.b32.xlu0 %v780_v54, %s1269_s11 }
 0x606   : > { %799 = vrot.lane.b32.xlu1 %v798_v55, %s1268_s10  ;;  %785 = vrot.lane.b32.xlu0 %v784_v56, %s1268_s10  ;;  %s1273_s10 = smov [#allocation8]  }
 0x607   : > { %s1194_s11 = sshll.u32 %s1273_s10, 4  ;;  %s1195_s11 = int_to_ptr.vmem [resolvable:$false] %s1194_s11 }
 0x608   : > { %s1196_s22 = scalar_lea.vmem %s1195_s11, 64  ;;  %p1197_p6 = scmp.lt.s32.totalorder %s849_s14, %s1195_s11 }
 0x609   : > { %p1198_p12 = scmp.lt.s32.totalorder %s1196_s22, %s1190_s8 }
 0x60b   : > { %p1199_p7 = por %p1198_p12, %p1197_p6 }
 0x60d   : > { %p1200_p9 = pnand %p1199_p7, %p1193_p2 }
 0x670   : > { %v792_v57 = vpop.permute.xlu1 %791  ;;  %v778_v58 = vpop.permute.xlu0 %777 }
 0x671   : > { %v807_v3 = vsel %vm281_vm1, %v788_v2, %v792_v57  ;;  %v802_v4 = vsel %vm281_vm1, %v772_v49, %v778_v58 }
 0x674   : > { %v796_v62 = vpop.permute.xlu1 %795  ;;  %v782_v63 = vpop.permute.xlu0 %781 }
 0x675   : > { %v808_v5 = vsel %vm803_vm4, %v807_v3, %v796_v62  ;;  %v804_v6 = vsel %vm803_vm4, %v802_v4, %v782_v63 }
 0x678   : > { %v800_v7 = vpop.permute.xlu1 %799  ;;  %v786_v9 = vpop.permute.xlu0 %785 }
 0x679   : > { %v809_v10 = vsel %vm805_vm5, %v808_v5, %v800_v7  ;;  %v806_v11 = vsel %vm805_vm5, %v804_v6, %v786_v9 }
 0x67a   : > { %v812_v12 = vcombine.low %v806_v11, %v809_v10 }
 0x67c   : > { %v819_v13 = vrot.slane %v812_v12, %v818_v8 }
 0x67e   : > { %v826_v14 = vrot.slane %v819_v13, %v818_v8 }
 0x680   : > { %832 = vst.msk [vmem:[%s268_s9] sm:$0x3] %vm830_vm6, %v826_v14 }
 0x681   : > { %1203 = shalt.err (!%p1200_p9)
}
 0x682   : > { %s1204_s12 = scalar_lea.hbm %s846_s24, 32  ;;  %s1208_s29 = scalar_lea.hbm %s1528_s5, 64 }
 0x683   : > { %p1205_p13 = scmp.ne.s32.totalorder %s846_s24, %s1204_s12  ;;  %p1209_p0 = scmp.lt.s32.totalorder %s846_s24, %s1528_s5 }
 0x684   : > { %p1210_p4 = scmp.lt.s32.totalorder %s1208_s29, %s1204_s12 }
 0x685   : > { %p1206_p5 = pnand %p1205_p13, %p1544_p11 }
 0x686   : > { %p1211_p8 = por %p1210_p4, %p1209_p0 }
 0x687   : > { %p1207_p10 = pneg %p1206_p5 }
 0x689   : > { %p1212_p3 = pnand %p1211_p8, %p1207_p10 }
 0x68b   : > { %1215 = shalt.err (!%p1212_p3)
}
 0x68c   : > { %1035 = dma.vmem_to_hbm [thread:$0]  (%p1544_p11), %s849_s14, 32, %s846_s24, %s834_s26  }
 0x68d PF: > { %s860_s7 = sand.u32 1, %s1246_s18   ;;  %p1545_p1 = scmp.ne.s32.totalorder %s1534_s25, 0 }
 0x68e   : > { %p1546_p2 = scmp.ge.s32.totalorder %s1258_s21, 2  ;;  %s861_s9 = scalar_lea.sflag [#allocation4], %s860_s7 }
 0x690   : > { %p1049_p6 = pnand %p1546_p2, %p1545_p1 }
 0x692   : > { %p1050_p12 = pneg %p1049_p6 }
 0x694   : > { %1241 = dma.done.wait (%p1050_p12), %s861_s9, 32  }
 0x695   : > { %1243 = vsyncadd (%p1050_p12), %s861_s9, 4294967264  ;;  %p19_p7 = scmp.ge.s32.totalorder %s1376_s15, 4   ;;  %s1547_s18 = smov %s1250_s19 }
 0x696   : > { %s1548_s19 = smov %s1254_s20  ;;  %s1549_s20 = smov %s1392_s27 }
 0x697   : > { %s1550_s21 = smov %s1376_s15  ;;  %21 = sbr.rel (!%p19_p7) target bundleno = 6 (0x6), region = 93 }
 0x69c   :  { %866 = vsyncpa [#allocation3], 1 }
 0x69d   :  { %868 = vsyncpa [#allocation3 + $0x1], 1 }
 0x69e   :  { %869 = vsyncpa [#allocation6], 1 }
 0x69f   :  { %870 = vsyncpa [#allocation4], 1 }
 0x6a0   :  { %872 = vsyncpa [#allocation4 + $0x1], 1 }

</bundles_post_ra>
